<compile_context>
chip_gen: v7x
topology: tpu7x:2x2x1
jax: 0.10.0
libtpu: 0.0.40
codegen_flags: <defaults>
</compile_context>

<pallas_src>
import jax
import jax.numpy as jnp
from jax.experimental import pallas as pl
from jax.experimental.pallas import tpu as pltpu


# --------------------------------------------------------------------------
# Kernel
# --------------------------------------------------------------------------
def _multimodal_kernel(img_ref, txt_ref,
                       wi_ref, bi_ref,
                       wt_ref, bt_ref,
                       wfi_ref, wft_ref, bf_ref,
                       out_ref):
    # image branch: relu(img @ Wi + bi) — bf16 matmul, f32 accumulate,
    # bias-add & ReLU on the f32 accumulator.
    h_img = jnp.dot(img_ref[...], wi_ref[...],
                    preferred_element_type=jnp.float32) + bi_ref[...]
    h_img = jnp.maximum(h_img, 0.0)

    # text branch: relu(txt @ Wt + bt)
    h_txt = jnp.dot(txt_ref[...], wt_ref[...],
                    preferred_element_type=jnp.float32) + bt_ref[...]
    h_txt = jnp.maximum(h_txt, 0.0)

    # fusion Linear with the weight split in two: mathematically identical to
    # concat([h_img, h_txt], -1) @ Wf, but with no lane-axis concatenate.
    out = jnp.dot(h_img.astype(wfi_ref.dtype), wfi_ref[...],
                  preferred_element_type=jnp.float32)
    out = out + jnp.dot(h_txt.astype(wft_ref.dtype), wft_ref[...],
                        preferred_element_type=jnp.float32)
    out_ref[...] = out + bf_ref[...]


# --------------------------------------------------------------------------
# One-time weight packing (hoisted out of the per-call path)
# --------------------------------------------------------------------------
def prepare_params(params):
    """Pack the PyTorch-style weights once: bf16 cast, fusion-weight split,
    class-dim zero-padding to a lane-dense multiple of 128."""
    wi, bi = params["fc_image"]   # (image_dim, 256), (1, 256)
    wt, bt = params["fc_text"]    # (text_dim, 256),  (1, 256)
    wf, bf = params["fc_fusion"]  # (512, num_classes), (1, num_classes)

    hidden = wi.shape[1]                               # 256
    num_classes = wf.shape[1]
    c_pad = ((num_classes + 127) // 128) * 128         # lane-dense classes

    # NOTE: the split at row `hidden` assumes both branches output `hidden`
    # features (true for this module: 256 + 256 = 512).
    wf_img = jnp.zeros((hidden, c_pad), jnp.float32).at[:, :num_classes].set(wf[:hidden])
    wf_txt = jnp.zeros((hidden, c_pad), jnp.float32).at[:, :num_classes].set(wf[hidden:])
    bf_p = jnp.zeros((1, c_pad), jnp.float32).at[:, :num_classes].set(bf)

    return {
        "wi": wi.astype(jnp.bfloat16), "bi": bi.astype(jnp.float32),
        "wt": wt.astype(jnp.bfloat16), "bt": bt.astype(jnp.float32),
        "wfi": wf_img.astype(jnp.bfloat16), "wft": wf_txt.astype(jnp.bfloat16),
        "bf": bf_p,
        # static metadata (Python ints)
        "hidden": hidden, "num_classes": num_classes, "c_pad": c_pad,
    }


# --------------------------------------------------------------------------
# Per-call wrapper
# --------------------------------------------------------------------------
def multimodal_classifier(image_features, text_features, packed, *, batch_tile=256):
    """image_features: [B, C, H, W] (NCHW) or already-flat [B, image_dim].
    `packed` comes from prepare_params (call once, reuse every step)."""
    B = image_features.shape[0]
    img = image_features.reshape(B, -1).astype(jnp.bfloat16)   # == torch .view(B, -1)
    txt = text_features.reshape(B, -1).astype(jnp.bfloat16)
    image_dim, text_dim = img.shape[1], txt.shape[1]

    hidden = packed["hidden"]
    num_classes = packed["num_classes"]
    c_pad = packed["c_pad"]

    # Batch tile: 256 rows (full MXU row utilisation on v6e/v7x) when the
    # batch allows it, otherwise the whole batch padded to 8 sublanes (f32).
    tb = batch_tile if B >= batch_tile else max(8, ((B + 7) // 8) * 8)
    b_pad = ((B + tb - 1) // tb) * tb
    if b_pad != B:
        img = jnp.pad(img, ((0, b_pad - B), (0, 0)))
        txt = jnp.pad(txt, ((0, b_pad - B), (0, 0)))

    grid = (b_pad // tb,)

    # Constant index_maps keep all weights/biases VMEM-resident across grid
    # steps; only the activation / output tiles stream.
    act_img_spec = pl.BlockSpec((tb, image_dim), lambda i: (i, 0))
    act_txt_spec = pl.BlockSpec((tb, text_dim), lambda i: (i, 0))
    const = lambda shape: pl.BlockSpec(shape, lambda i: (0, 0))
    out_spec = pl.BlockSpec((tb, c_pad), lambda i: (i, 0))

    flops = 2 * b_pad * (image_dim * hidden
                         + text_dim * hidden
                         + 2 * hidden * c_pad)
    bytes_accessed = (
        2 * (img.size + txt.size                                  # bf16 activations
             + packed["wi"].size + packed["wt"].size
             + packed["wfi"].size + packed["wft"].size)           # bf16 weights
        + 4 * (packed["bi"].size + packed["bt"].size + packed["bf"].size)  # f32 biases
        + 4 * b_pad * c_pad)                                      # f32 output

    out = pl.pallas_call(
        _multimodal_kernel,
        out_shape=jax.ShapeDtypeStruct((b_pad, c_pad), jnp.float32),
        grid=grid,
        in_specs=[
            act_img_spec,                       # img   (tb, image_dim)
            act_txt_spec,                       # txt   (tb, text_dim)
            const((image_dim, hidden)),         # Wi
            const((1, hidden)),                 # bi
            const((text_dim, hidden)),          # Wt
            const((1, hidden)),                 # bt
            const((hidden, c_pad)),             # Wf (image half)
            const((hidden, c_pad)),             # Wf (text half)
            const((1, c_pad)),                  # bf
        ],
        out_specs=out_spec,
        compiler_params=pltpu.CompilerParams(
            dimension_semantics=("parallel",)),
        cost_estimate=pl.CostEstimate(flops=flops, transcendentals=0,
                                      bytes_accessed=bytes_accessed),
    )(img, txt,
      packed["wi"], packed["bi"],
      packed["wt"], packed["bt"],
      packed["wfi"], packed["wft"], packed["bf"])

    # Slice the padded lane-dense slab back to the logical result.  (Downstream
    # consumers that can read the padded slab directly may skip this.)
    return out[:B, :num_classes]


# --------------------------------------------------------------------------
# Init + references
# --------------------------------------------------------------------------
def init_params(key, image_dim, text_dim, num_classes):
    """Deterministic init matching the PyTorch module's layer shapes.
    Weights stored transposed: (in_dim, out_dim)."""
    ks = jax.random.split(key, 6)

    def linear(kw, kb, in_dim, out_dim):
        bound = 1.0 / jnp.sqrt(in_dim)
        w = jax.random.uniform(kw, (in_dim, out_dim), jnp.float32, -bound, bound)
        b = jax.random.uniform(kb, (1, out_dim), jnp.float32, -bound, bound)
        return w, b

    return {
        "fc_image": linear(ks[0], ks[1], image_dim, 256),
        "fc_text": linear(ks[2], ks[3], text_dim, 256),
        "fc_fusion": linear(ks[4], ks[5], 256 * 2, num_classes),
    }


def _reference_bf16(image_features, text_features, params):
    """Pure-JAX reference with the same bf16-matmul / f32-accumulate recipe."""
    B = image_features.shape[0]
    img = image_features.reshape(B, -1).astype(jnp.bfloat16)
    txt = text_features.reshape(B, -1).astype(jnp.bfloat16)
    wi, bi = params["fc_image"]
    wt, bt = params["fc_text"]
    wf, bf = params["fc_fusion"]
    h_img = jnp.maximum(
        jnp.dot(img, wi.astype(jnp.bfloat16),
                preferred_element_type=jnp.float32) + bi, 0.0)
    h_txt = jnp.maximum(
        jnp.dot(txt, wt.astype(jnp.bfloat16),
                preferred_element_type=jnp.float32) + bt, 0.0)
    comb = jnp.concatenate([h_img, h_txt], axis=1).astype(jnp.bfloat16)
    return jnp.dot(comb, wf.astype(jnp.bfloat16),
                   preferred_element_type=jnp.float32) + bf


def _reference_f32(image_features, text_features, params):
    """Full-precision reference (module semantics)."""
    B = image_features.shape[0]
    img = image_features.reshape(B, -1)
    txt = text_features.reshape(B, -1)
    wi, bi = params["fc_image"]
    wt, bt = params["fc_text"]
    wf, bf = params["fc_fusion"]
    h_img = jnp.maximum(img @ wi + bi, 0.0)
    h_txt = jnp.maximum(txt @ wt + bt, 0.0)
    return jnp.concatenate([h_img, h_txt], axis=1) @ wf + bf


if __name__ == "__main__":
    key = jax.random.PRNGKey(0)
    k_img, k_txt, k_par = jax.random.split(key, 3)

    # small shapes: image features NCHW [2, 4, 16, 16] -> image_dim = 1024
    B, C, H, W = 2, 4, 16, 16
    image_dim = C * H * W
    text_dim = 32
    num_classes = 10

    image_features = jax.random.normal(k_img, (B, C, H, W), jnp.float32)
    text_features = jax.random.normal(k_txt, (B, text_dim), jnp.float32)
    params = init_params(k_par, image_dim, text_dim, num_classes)

    # One-time weight packing (bf16 cast / fusion split / class padding).
    packed = jax.tree_util.tree_map(
        lambda x: jax.block_until_ready(x) if isinstance(x, jax.Array) else x,
        prepare_params(params))

    out = multimodal_classifier(image_features, text_features, packed)
    out = jax.block_until_ready(out)
    assert out.shape == (B, num_classes)

    # Tight check against a reference using the same bf16/f32-acc recipe.
    ref_bf16 = _reference_bf16(image_features, text_features, params)
    assert jnp.allclose(out, ref_bf16, atol=1e-2, rtol=1e-2)

    # Loose check against the full-f32 module semantics (bf16 rounding budget).
    ref_f32 = _reference_f32(image_features, text_features, params)
    assert jnp.allclose(out, ref_f32, atol=1e-1, rtol=1e-1)

    print("KERNEL_OK")
</pallas_src>

<mosaic_0001>
module attributes {stable_mosaic.version = 11 : i64} {
  func.func @_multimodal_kernel(%arg0: i32, %arg1: memref<8x1024xbf16, #tpu.memory_space<vmem>>, %arg2: memref<8x32xbf16, #tpu.memory_space<vmem>>, %arg3: memref<1024x256xbf16, #tpu.memory_space<vmem>>, %arg4: memref<1x256xf32, #tpu.memory_space<vmem>>, %arg5: memref<32x256xbf16, #tpu.memory_space<vmem>>, %arg6: memref<1x256xf32, #tpu.memory_space<vmem>>, %arg7: memref<256x128xbf16, #tpu.memory_space<vmem>>, %arg8: memref<256x128xbf16, #tpu.memory_space<vmem>>, %arg9: memref<1x128xf32, #tpu.memory_space<vmem>>, %arg10: memref<8x128xf32, #tpu.memory_space<vmem>>) attributes {dimension_semantics = [#tpu.dimension_semantics<parallel>], iteration_bounds = array<i64: 1>, scalar_prefetch = 0 : i64, scratch_operands = 0 : i64, tpu.core_type = #tpu.core_type<tc>, window_params = [{transform_indices = @transform_0, window_bounds = array<i64: 8, 1024>}, {transform_indices = @transform_1, window_bounds = array<i64: 8, 32>}, {pipeline_mode = #tpu.pipeline_mode<synchronous>, transform_indices = @transform_2, window_bounds = array<i64: 1024, 256>}, {pipeline_mode = #tpu.pipeline_mode<synchronous>, transform_indices = @transform_3, window_bounds = array<i64: 1, 256>}, {pipeline_mode = #tpu.pipeline_mode<synchronous>, transform_indices = @transform_4, window_bounds = array<i64: 32, 256>}, {pipeline_mode = #tpu.pipeline_mode<synchronous>, transform_indices = @transform_5, window_bounds = array<i64: 1, 256>}, {pipeline_mode = #tpu.pipeline_mode<synchronous>, transform_indices = @transform_6, window_bounds = array<i64: 256, 128>}, {pipeline_mode = #tpu.pipeline_mode<synchronous>, transform_indices = @transform_7, window_bounds = array<i64: 256, 128>}, {pipeline_mode = #tpu.pipeline_mode<synchronous>, transform_indices = @transform_8, window_bounds = array<i64: 1, 128>}, {transform_indices = @transform_9, window_bounds = array<i64: 8, 128>}]} {
    %c0 = arith.constant 0 : index
    %c0_0 = arith.constant 0 : index
    %0 = vector.load %arg1[%c0, %c0_0] : memref<8x1024xbf16, #tpu.memory_space<vmem>>, vector<8x1024xbf16>
    %c0_1 = arith.constant 0 : index
    %c0_2 = arith.constant 0 : index
    %1 = vector.load %arg3[%c0_1, %c0_2] : memref<1024x256xbf16, #tpu.memory_space<vmem>>, vector<1024x256xbf16>
    %cst = arith.constant dense<0.000000e+00> : vector<8x256xf32>
    %2 = tpu.matmul %0, %1, %cst {dimension_numbers = #tpu.dot_dimension_numbers<[1], [0], [0], [1], [0, 0, 1, 1], [], []>} : vector<8x1024xbf16>, vector<1024x256xbf16>, vector<8x256xf32> -> vector<8x256xf32>
    %c0_3 = arith.constant 0 : index
    %c0_4 = arith.constant 0 : index
    %3 = vector.load %arg4[%c0_3, %c0_4] : memref<1x256xf32, #tpu.memory_space<vmem>>, vector<1x256xf32>
    %4 = vector.broadcast %3 : vector<1x256xf32> to vector<8x256xf32>
    %5 = arith.addf %2, %4 : vector<8x256xf32>
    %cst_5 = arith.constant 0.000000e+00 : f32
    %6 = vector.broadcast %cst_5 : f32 to vector<8x256xf32>
    %7 = arith.maximumf %5, %6 : vector<8x256xf32>
    %c0_6 = arith.constant 0 : index
    %c0_7 = arith.constant 0 : index
    %8 = vector.load %arg2[%c0_6, %c0_7] : memref<8x32xbf16, #tpu.memory_space<vmem>>, vector<8x32xbf16>
    %c0_8 = arith.constant 0 : index
    %c0_9 = arith.constant 0 : index
    %9 = vector.load %arg5[%c0_8, %c0_9] : memref<32x256xbf16, #tpu.memory_space<vmem>>, vector<32x256xbf16>
    %cst_10 = arith.constant dense<0.000000e+00> : vector<8x256xf32>
    %10 = tpu.matmul %8, %9, %cst_10 {dimension_numbers = #tpu.dot_dimension_numbers<[1], [0], [0], [1], [0, 0, 1, 1], [], []>} : vector<8x32xbf16>, vector<32x256xbf16>, vector<8x256xf32> -> vector<8x256xf32>
    %c0_11 = arith.constant 0 : index
    %c0_12 = arith.constant 0 : index
    %11 = vector.load %arg6[%c0_11, %c0_12] : memref<1x256xf32, #tpu.memory_space<vmem>>, vector<1x256xf32>
    %12 = vector.broadcast %11 : vector<1x256xf32> to vector<8x256xf32>
    %13 = arith.addf %10, %12 : vector<8x256xf32>
    %cst_13 = arith.constant 0.000000e+00 : f32
    %14 = vector.broadcast %cst_13 : f32 to vector<8x256xf32>
    %15 = arith.maximumf %13, %14 : vector<8x256xf32>
    %16 = arith.truncf %7 : vector<8x256xf32> to vector<8x256xbf16>
    %c0_14 = arith.constant 0 : index
    %c0_15 = arith.constant 0 : index
    %17 = vector.load %arg7[%c0_14, %c0_15] : memref<256x128xbf16, #tpu.memory_space<vmem>>, vector<256x128xbf16>
    %cst_16 = arith.constant dense<0.000000e+00> : vector<8x128xf32>
    %18 = tpu.matmul %16, %17, %cst_16 {dimension_numbers = #tpu.dot_dimension_numbers<[1], [0], [0], [1], [0, 0, 1, 1], [], []>} : vector<8x256xbf16>, vector<256x128xbf16>, vector<8x128xf32> -> vector<8x128xf32>
    %19 = arith.truncf %15 : vector<8x256xf32> to vector<8x256xbf16>
    %c0_17 = arith.constant 0 : index
    %c0_18 = arith.constant 0 : index
    %20 = vector.load %arg8[%c0_17, %c0_18] : memref<256x128xbf16, #tpu.memory_space<vmem>>, vector<256x128xbf16>
    %cst_19 = arith.constant dense<0.000000e+00> : vector<8x128xf32>
    %21 = tpu.matmul %19, %20, %cst_19 {dimension_numbers = #tpu.dot_dimension_numbers<[1], [0], [0], [1], [0, 0, 1, 1], [], []>} : vector<8x256xbf16>, vector<256x128xbf16>, vector<8x128xf32> -> vector<8x128xf32>
    %22 = arith.addf %18, %21 : vector<8x128xf32>
    %c0_20 = arith.constant 0 : index
    %c0_21 = arith.constant 0 : index
    %23 = vector.load %arg9[%c0_20, %c0_21] : memref<1x128xf32, #tpu.memory_space<vmem>>, vector<1x128xf32>
    %24 = vector.broadcast %23 : vector<1x128xf32> to vector<8x128xf32>
    %25 = arith.addf %22, %24 : vector<8x128xf32>
    %c0_22 = arith.constant 0 : index
    %c0_23 = arith.constant 0 : index
    %26 = vector.load %arg10[%c0_22, %c0_23] : memref<8x128xf32, #tpu.memory_space<vmem>>, vector<8x128xf32>
    tpu.vector_store %arg10[%c0_22, %c0_23], %25 {strides = array<i32>} : memref<8x128xf32, #tpu.memory_space<vmem>>, vector<8x128xf32>,
    return
  }
  func.func @transform_0(%arg0: i32) -> (i32, i32) {
    %c0_i32 = arith.constant 0 : i32
    %c0_i32_0 = arith.constant 0 : i32
    return %arg0, %c0_i32 : i32, i32
  }
  func.func @transform_1(%arg0: i32) -> (i32, i32) {
    %c0_i32 = arith.constant 0 : i32
    %c0_i32_0 = arith.constant 0 : i32
    return %arg0, %c0_i32 : i32, i32
  }
  func.func @transform_2(%arg0: i32) -> (i32, i32) {
    %c0_i32 = arith.constant 0 : i32
    %c0_i32_0 = arith.constant 0 : i32
    %c0_i32_1 = arith.constant 0 : i32
    return %c0_i32, %c0_i32_0 : i32, i32
  }
  func.func @transform_3(%arg0: i32) -> (i32, i32) {
    %c0_i32 = arith.constant 0 : i32
    %c0_i32_0 = arith.constant 0 : i32
    %c0_i32_1 = arith.constant 0 : i32
    return %c0_i32, %c0_i32_0 : i32, i32
  }
  func.func @transform_4(%arg0: i32) -> (i32, i32) {
    %c0_i32 = arith.constant 0 : i32
    %c0_i32_0 = arith.constant 0 : i32
    %c0_i32_1 = arith.constant 0 : i32
    return %c0_i32, %c0_i32_0 : i32, i32
  }
  func.func @transform_5(%arg0: i32) -> (i32, i32) {
    %c0_i32 = arith.constant 0 : i32
    %c0_i32_0 = arith.constant 0 : i32
    %c0_i32_1 = arith.constant 0 : i32
    return %c0_i32, %c0_i32_0 : i32, i32
  }
  func.func @transform_6(%arg0: i32) -> (i32, i32) {
    %c0_i32 = arith.constant 0 : i32
    %c0_i32_0 = arith.constant 0 : i32
    %c0_i32_1 = arith.constant 0 : i32
    return %c0_i32, %c0_i32_0 : i32, i32
  }
  func.func @transform_7(%arg0: i32) -> (i32, i32) {
    %c0_i32 = arith.constant 0 : i32
    %c0_i32_0 = arith.constant 0 : i32
    %c0_i32_1 = arith.constant 0 : i32
    return %c0_i32, %c0_i32_0 : i32, i32
  }
  func.func @transform_8(%arg0: i32) -> (i32, i32) {
    %c0_i32 = arith.constant 0 : i32
    %c0_i32_0 = arith.constant 0 : i32
    %c0_i32_1 = arith.constant 0 : i32
    return %c0_i32, %c0_i32_0 : i32, i32
  }
  func.func @transform_9(%arg0: i32) -> (i32, i32) {
    %c0_i32 = arith.constant 0 : i32
    %c0_i32_0 = arith.constant 0 : i32
    return %arg0, %c0_i32 : i32, i32
  }
}

</mosaic_0001>

<bundles_post_ra>
// kernel: tpu_custom_call.1
= control target key start
LH: loop header
LB: loop body
LE: loop exit
PB: predicated region body
PF: predicated region fallthrough
CT: control target
= control target key end

     0   :  { %14 = vsyncpa [#allocation3], 0  ;;  %s2364_s0 = inlined_call_operand.hbm [shape: bf16[8,1024], index: 0, kind: input, shape index: {}]   ;;  %s2365_s1 = inlined_call_operand.hbm [shape: bf16[8,32], index: 1, kind: input, shape index: {}]   ;;  %s2366_s2 = inlined_call_operand.hbm [shape: bf16[1024,256], index: 2, kind: input, shape index: {}]   ;;  %s2367_s3 = inlined_call_operand.vmem [shape: f32[1,256], index: 3, kind: input, shape index: {}]   ;;  %s2368_s4 = inlined_call_operand.hbm [shape: bf16[32,256], index: 4, kind: input, shape index: {}]   ;;  %s2369_s5 = inlined_call_operand.vmem [shape: f32[1,256], index: 5, kind: input, shape index: {}]   ;;  %s2370_s6 = inlined_call_operand.hbm [shape: bf16[256,128], index: 6, kind: input, shape index: {}]   ;;  %s2371_s7 = inlined_call_operand.hbm [shape: bf16[256,128], index: 7, kind: input, shape index: {}]   ;;  %s2372_s8 = inlined_call_operand.vmem [shape: f32[1,128], index: 8, kind: input, shape index: {}]   ;;  %s2373_s9 = inlined_call_operand.hbm [shape: f32[8,128], index: 9, kind: output, shape index: {}]  }
   0x1   :  { %15 = vsyncpa [#allocation6], 0 }
   0x2   :  { %16 = vsyncpa [#allocation9], 0 }
   0x3   :  { %17 = vsyncpa [#allocation12], 0 }
   0x4   :  { %18 = vsyncpa [#allocation4], 0  ;;  %s2185_s30 = smov [#allocation5]   ;;  %s2021_s13 = scalar_lea.hbm %s2365_s1, 64 }
   0x5   :  { %s35_s10 = sshll.u32 %s2185_s30, 4  ;;  %p2022_p0 = scmp.ne.s32.totalorder %s2365_s1, %s2021_s13  ;;  %s36_s10 = int_to_ptr.vmem [resolvable:$true] %s35_s10 }
   0x6   :  { %p2025_p1 = scmp.lt.u32.totalorder %s2021_s13, %s2365_s1 }
   0x8   :  { %p2027_p2 = pnand %p2025_p1, %p2022_p0 }
   0xa   :  { %2030 = shalt.err (!%p2027_p2)
}
   0xb   :  { %s2031_s18 = scalar_lea.vmem %s36_s10, 64  ;;  %p2036_p4 = scmp.lt.s32.totalorder %s36_s10, %s36_s10 }
   0xc   :  { %p2032_p3 = scmp.ne.s32.totalorder %s36_s10, %s2031_s18  ;;  %p2037_p5 = scmp.lt.s32.totalorder %s2031_s18, %s2031_s18 }
   0xe   :  { %p2038_p6 = por %p2037_p5, %p2036_p4 }
  0x10   :  { %p2039_p7 = pnand %p2038_p6, %p2032_p3 }
  0x12   :  { %2042 = shalt.err (!%p2039_p7)
}
  0x13   :  { %38 = dma.hbm_to_vmem [thread:$0]  %s2365_s1, 64, %s36_s10, [#allocation6]  }
  0x14   :  { %s2186_s21 = smov [#allocation8]   ;;  %s2187_s23 = smov [#allocation2]  }
  0x15   :  { %s58_s22 = sshll.u32 %s2186_s21, 4  ;;  %s25_s24 = sshll.u32 %s2187_s23, 4  ;;  %s59_s22 = int_to_ptr.vmem [resolvable:$true] %s58_s22  ;;  %s26_s24 = int_to_ptr.vmem [resolvable:$true] %s25_s24 }
  0x16   :  { %s2043_s27 = scalar_lea.hbm %s2368_s4, 512 }
  0x17   :  { %p2044_p8 = scmp.ne.s32.totalorder %s2368_s4, %s2043_s27  ;;  %p2047_p9 = scmp.lt.u32.totalorder %s2043_s27, %s2368_s4 }
  0x19   :  { %p2049_p10 = pnand %p2047_p9, %p2044_p8 }
  0x1b   :  { %2052 = shalt.err (!%p2049_p10)
}
  0x1c   :  { %s2053_s1 = scalar_lea.vmem %s59_s22, 512  ;;  %p2058_p12 = scmp.lt.s32.totalorder %s59_s22, %s59_s22 }
  0x1d   :  { %p2054_p11 = scmp.ne.s32.totalorder %s59_s22, %s2053_s1  ;;  %p2059_p13 = scmp.lt.s32.totalorder %s2053_s1, %s2053_s1 }
  0x1f   :  { %p2060_p0 = por %p2059_p13, %p2058_p12 }
  0x21   :  { %p2061_p1 = pnand %p2060_p0, %p2054_p11 }
  0x23   :  { %2064 = shalt.err (!%p2061_p1)
}
  0x24   :  { %s2188_s10 = smov 128   ;;  %s2189_s12 = smov 8  }
  0x25   :  { %64 = dma.hbm_to_vmem [thread:$0]  %s2368_s4, 512, %s59_s22, [#allocation9], %s2188_s10, %s2188_s10, %s2189_s12  }
  0x26   :  { %s2065_s17 = scalar_lea.hbm %s2364_s0, 512 }
  0x27   :  { %p2066_p2 = scmp.ne.s32.totalorder %s2364_s0, %s2065_s17  ;;  %p2069_p3 = scmp.lt.u32.totalorder %s2065_s17, %s2364_s0 }
  0x29   :  { %p2071_p4 = pnand %p2069_p3, %p2066_p2 }
  0x2b   :  { %2074 = shalt.err (!%p2071_p4)
}
  0x2c   :  { %s2075_s23 = scalar_lea.vmem %s26_s24, 512  ;;  %p2080_p6 = scmp.lt.s32.totalorder %s26_s24, %s26_s24 }
  0x2d   :  { %p2076_p5 = scmp.ne.s32.totalorder %s26_s24, %s2075_s23  ;;  %p2081_p7 = scmp.lt.s32.totalorder %s2075_s23, %s2075_s23 }
  0x2f   :  { %p2082_p8 = por %p2081_p7, %p2080_p6 }
  0x31   :  { %p2083_p9 = pnand %p2082_p8, %p2076_p5 }
  0x33   :  { %2086 = shalt.err (!%p2083_p9)
}
  0x34   :  { %28 = dma.hbm_to_vmem [thread:$0]  %s2364_s0, 512, %s26_s24, [#allocation3]  }
  0x35   :  { %s2190_s25 = smov [#allocation7]   ;;  %s2191_s27 = smov [#allocation10]  }
  0x36   :  { %s44_s26 = sshll.u32 %s2190_s25, 4  ;;  %s72_s28 = sshll.u32 %s2191_s27, 4  ;;  %s45_s26 = int_to_ptr.vmem [resolvable:$true] %s44_s26  ;;  %s73_s28 = int_to_ptr.vmem [resolvable:$true] %s72_s28 }
  0x37   :  { %s2087_s11 = scalar_lea.hbm %s2366_s2, 16384 }
  0x38   :  { %p2088_p10 = scmp.ne.s32.totalorder %s2366_s2, %s2087_s11  ;;  %p2091_p11 = scmp.lt.u32.totalorder %s2087_s11, %s2366_s2 }
  0x3a   :  { %p2093_p12 = pnand %p2091_p11, %p2088_p10 }
  0x3c   :  { %2096 = shalt.err (!%p2093_p12)
}
  0x3d   :  { %s2097_s0 = scalar_lea.vmem %s45_s26, 16384  ;;  %p2102_p0 = scmp.lt.s32.totalorder %s45_s26, %s45_s26 }
  0x3e   :  { %p2098_p13 = scmp.ne.s32.totalorder %s45_s26, %s2097_s0  ;;  %p2103_p1 = scmp.lt.s32.totalorder %s2097_s0, %s2097_s0 }
  0x40   :  { %p2104_p2 = por %p2103_p1, %p2102_p0 }
  0x42   :  { %p2105_p3 = pnand %p2104_p2, %p2098_p13 }
  0x44   :  { %2108 = shalt.err (!%p2105_p3)
}
  0x45   :  { %50 = dma.hbm_to_vmem [thread:$0]  %s2366_s2, 16384, %s45_s26, [#allocation6], %s2188_s10, %s2188_s10, %s2189_s12  }
  0x46   :  { %s2109_s19 = scalar_lea.hbm %s2370_s6, 2048 }
  0x47   :  { %p2110_p4 = scmp.ne.s32.totalorder %s2370_s6, %s2109_s19  ;;  %p2113_p5 = scmp.lt.u32.totalorder %s2109_s19, %s2370_s6 }
  0x49   :  { %p2115_p6 = pnand %p2113_p5, %p2110_p4 }
  0x4b   :  { %2118 = shalt.err (!%p2115_p6)
}
  0x4c   :  { %s2119_s22 = scalar_lea.vmem %s73_s28, 2048  ;;  %p2124_p8 = scmp.lt.s32.totalorder %s73_s28, %s73_s28 }
  0x4d   :  { %p2120_p7 = scmp.ne.s32.totalorder %s73_s28, %s2119_s22  ;;  %p2125_p9 = scmp.lt.s32.totalorder %s2119_s22, %s2119_s22 }
  0x4f   :  { %p2126_p10 = por %p2125_p9, %p2124_p8 }
  0x51   :  { %p2127_p11 = pnand %p2126_p10, %p2120_p7 }
  0x53   :  { %2130 = shalt.err (!%p2127_p11)
}
  0x54   :  { %s2192_s2 = smov 64   ;;  %s2193_s10 = smov 4  }
  0x55   :  { %78 = dma.hbm_to_vmem [thread:$0]  %s2370_s6, 2048, %s73_s28, [#allocation9], %s2192_s2, %s2192_s2, %s2193_s10  }
  0x56   :  { %s2194_s26 = smov [#allocation11]   ;;  %s2131_s11 = scalar_lea.hbm %s2371_s7, 2048 }
  0x57   :  { %s84_s27 = sshll.u32 %s2194_s26, 4  ;;  %p2132_p12 = scmp.ne.s32.totalorder %s2371_s7, %s2131_s11  ;;  %s85_s27 = int_to_ptr.vmem [resolvable:$true] %s84_s27 }
  0x58   :  { %p2135_p13 = scmp.lt.u32.totalorder %s2131_s11, %s2371_s7 }
  0x5a   :  { %p2137_p0 = pnand %p2135_p13, %p2132_p12 }
  0x5c   :  { %2140 = shalt.err (!%p2137_p0)
}
  0x5d   :  { %s2141_s0 = scalar_lea.vmem %s85_s27, 2048  ;;  %p2146_p2 = scmp.lt.s32.totalorder %s85_s27, %s85_s27 }
  0x5e   :  { %p2142_p1 = scmp.ne.s32.totalorder %s85_s27, %s2141_s0  ;;  %p2147_p3 = scmp.lt.s32.totalorder %s2141_s0, %s2141_s0 }
  0x60   :  { %p2148_p4 = por %p2147_p3, %p2146_p2 }
  0x62   :  { %p2149_p5 = pnand %p2148_p4, %p2142_p1 }
  0x64   :  { %2152 = shalt.err (!%p2149_p5)
}
  0x65   :  { %90 = dma.hbm_to_vmem [thread:$0]  %s2371_s7, 2048, %s85_s27, [#allocation12], %s2192_s2, %s2192_s2, %s2193_s10  }
  0x66   :  { %2175 = dma.done.wait [#allocation3], 512  }
  0x67   :  { %2176 = vsyncadd [#allocation3], 4294966784 }
  0x68   :  { %2177 = dma.done.wait [#allocation6], 16448  }
  0x69   :  { %2178 = vsyncadd [#allocation6], 4294950848 }
  0x6a   :  { %2179 = dma.done.wait [#allocation9], 2560  }
  0x6b   :  { %2180 = vsyncadd [#allocation9], 4294964736 }
  0x6c   :  { %2181 = dma.done.wait [#allocation12], 2048  }
  0x6d   :  { %2182 = vsyncadd [#allocation12], 4294965248  ;;  %v1783_v0 = vld [vmem:[#allocation7 + $0x104] ss:$8 sps:$4 sm:$0xff]   ;;  %v1785_v1 = vld [vmem:[#allocation7 + $0x100] ss:$8 sps:$4 sm:$0xff]  }
  0x6e   :  { %965 = vmatprep.subr.bf16.mxu0 %v1783_v0  ;;  %v1786_v2 = vld [vmem:[#allocation7 + $0x114] ss:$8 sps:$4 sm:$0xff]   ;;  %v1788_v3 = vld [vmem:[#allocation7 + $0x110] ss:$8 sps:$4 sm:$0xff]   ;;  %v1789_v4 = vld [vmem:[#allocation7 + $0x124] ss:$8 sps:$4 sm:$0xff]  }
  0x6f   :  { %966 = vmatpush1.bf16.msra.mxu0 %v1785_v1  ;;  %v1791_v5 = vld [vmem:[#allocation7 + $0x120] ss:$8 sps:$4 sm:$0xff]   ;;  %v1792_v6 = vld [vmem:[#allocation7 + $0x134] ss:$8 sps:$4 sm:$0xff]   ;;  %v1794_v7 = vld [vmem:[#allocation7 + $0x130] ss:$8 sps:$4 sm:$0xff]  }
  0x70   :  { %967 = vmatprep.subr.bf16.mxu0 %v1786_v2  ;;  %v1795_v8 = vld [vmem:[#allocation7 + $0x144] ss:$8 sps:$4 sm:$0xff]   ;;  %v1797_v9 = vld [vmem:[#allocation7 + $0x140] ss:$8 sps:$4 sm:$0xff]   ;;  %v1798_v10 = vld [vmem:[#allocation7 + $0x154] ss:$8 sps:$4 sm:$0xff]  }
  0x71   :  { %v1800_v11 = vld [vmem:[#allocation7 + $0x150] ss:$8 sps:$4 sm:$0xff]   ;;  %v1801_v12 = vld [vmem:[#allocation7 + $0x164] ss:$8 sps:$4 sm:$0xff]   ;;  %v1803_v15 = vld [vmem:[#allocation7 + $0x160] ss:$8 sps:$4 sm:$0xff]  }
  0x72   :  { %v2325_v13 = vld [vmem:[#allocation2 + $0x8] sm:$0xff]  ;;  %v1804_v16 = vld [vmem:[#allocation7 + $0x174] ss:$8 sps:$4 sm:$0xff]   ;;  %v1806_v17 = vld [vmem:[#allocation7 + $0x170] ss:$8 sps:$4 sm:$0xff]   ;;  %vm1127_vm0 = vcmask 261120  }
  0x73   :  { %968 = vmatpush1.bf16.msra.mxu0 %v1788_v3  ;;  %v1544_v14 = vcombine.high %v2325_v13, %v2325_v13  ;;  %v1807_v18 = vld [vmem:[#allocation7 + $0x184] ss:$8 sps:$4 sm:$0xff]   ;;  %v1809_v20 = vld [vmem:[#allocation7 + $0x180] ss:$8 sps:$4 sm:$0xff]   ;;  %v1854_v22 = vld [vmem:[#allocation7 + $0x14] ss:$8 sps:$4 sm:$0xff]   ;;  %v1543_v55 = vcombine.low %v2325_v13, %v2325_v13 }
  0x74   :  { %969 = vmatprep.subr.bf16.mxu0 %v1789_v4  ;;  %v1848_v19 = vld [vmem:[#allocation7 + $0x4] ss:$8 sps:$4 sm:$0xff]   ;;  %v1853_v21 = vld [vmem:[#allocation7] ss:$8 sps:$4 sm:$0xff]   ;;  %v1810_v23 = vld [vmem:[#allocation7 + $0x194] ss:$8 sps:$4 sm:$0xff]  }
  0x75   :  { %997 = vmatprep.mubr.bf16.mxu0 %v1544_v14  ;;  %924 = vmatprep.subr.bf16.mxu1 %v1848_v19  ;;  %v1859_v24 = vld [vmem:[#allocation7 + $0x10] ss:$8 sps:$4 sm:$0xff]   ;;  %v1860_v25 = vld [vmem:[#allocation7 + $0x24] ss:$8 sps:$4 sm:$0xff]   ;;  %v1865_v28 = vld [vmem:[#allocation7 + $0x20] ss:$8 sps:$4 sm:$0xff]  }
  0x76   :  { %925 = vmatpush1.bf16.msra.mxu1 %v1853_v21  ;;  %v1812_v26 = vld [vmem:[#allocation7 + $0x190] ss:$8 sps:$4 sm:$0xff]   ;;  %v1813_v27 = vld [vmem:[#allocation7 + $0x1a4] ss:$8 sps:$4 sm:$0xff]   ;;  %v1866_v29 = vld [vmem:[#allocation7 + $0x34] ss:$8 sps:$4 sm:$0xff]  }
  0x77   :  { %970 = vmatpush1.bf16.msra.mxu0 %v1791_v5  ;;  %926 = vmatprep.subr.bf16.mxu1 %v1854_v22  ;;  %v1815_v30 = vld [vmem:[#allocation7 + $0x1a0] ss:$8 sps:$4 sm:$0xff]   ;;  %v1816_v31 = vld [vmem:[#allocation7 + $0x1b4] ss:$8 sps:$4 sm:$0xff]   ;;  %v1871_v32 = vld [vmem:[#allocation7 + $0x30] ss:$8 sps:$4 sm:$0xff]  }
  0x78   :  { %971 = vmatprep.subr.bf16.mxu0 %v1792_v6  ;;  %v1872_v33 = vld [vmem:[#allocation7 + $0x44] ss:$8 sps:$4 sm:$0xff]   ;;  %v1818_v34 = vld [vmem:[#allocation7 + $0x1b0] ss:$8 sps:$4 sm:$0xff]   ;;  %v1877_v36 = vld [vmem:[#allocation7 + $0x40] ss:$8 sps:$4 sm:$0xff]  }
  0x79   :  { %v1819_v35 = vld [vmem:[#allocation7 + $0x1c4] ss:$8 sps:$4 sm:$0xff]   ;;  %v1878_v37 = vld [vmem:[#allocation7 + $0x54] ss:$8 sps:$4 sm:$0xff]   ;;  %v1821_v38 = vld [vmem:[#allocation7 + $0x1c0] ss:$8 sps:$4 sm:$0xff]  }
  0x7a   :  { %927 = vmatpush1.bf16.msra.mxu1 %v1859_v24  ;;  %v1822_v39 = vld [vmem:[#allocation7 + $0x1d4] ss:$8 sps:$4 sm:$0xff]   ;;  %v1883_v40 = vld [vmem:[#allocation7 + $0x50] ss:$8 sps:$4 sm:$0xff]   ;;  %v1884_v41 = vld [vmem:[#allocation7 + $0x64] ss:$8 sps:$4 sm:$0xff]  }
  0x7b   :  { %972 = vmatpush1.bf16.msra.mxu0 %v1794_v7  ;;  %928 = vmatprep.subr.bf16.mxu1 %v1860_v25  ;;  %v1824_v42 = vld [vmem:[#allocation7 + $0x1d0] ss:$8 sps:$4 sm:$0xff]   ;;  %v1825_v43 = vld [vmem:[#allocation7 + $0x1e4] ss:$8 sps:$4 sm:$0xff]   ;;  %v1889_v44 = vld [vmem:[#allocation7 + $0x60] ss:$8 sps:$4 sm:$0xff]  }
  0x7c   :  { %973 = vmatprep.subr.bf16.mxu0 %v1795_v8  ;;  %v1890_v45 = vld [vmem:[#allocation7 + $0x74] ss:$8 sps:$4 sm:$0xff]   ;;  %v1827_v46 = vld [vmem:[#allocation7 + $0x1e0] ss:$8 sps:$4 sm:$0xff]   ;;  %v1895_v48 = vld [vmem:[#allocation7 + $0x70] ss:$8 sps:$4 sm:$0xff]  }
  0x7d   :  { %v1828_v47 = vld [vmem:[#allocation7 + $0x1f4] ss:$8 sps:$4 sm:$0xff]   ;;  %v1896_v49 = vld [vmem:[#allocation7 + $0x84] ss:$8 sps:$4 sm:$0xff]   ;;  %v1830_v50 = vld [vmem:[#allocation7 + $0x1f0] ss:$8 sps:$4 sm:$0xff]  }
  0x7e   :  { %929 = vmatpush1.bf16.msra.mxu1 %v1865_v28  ;;  %v1835_v51 = vld [vmem:[#allocation7 + $0x204] ss:$8 sps:$4 sm:$0xff]   ;;  %v1901_v52 = vld [vmem:[#allocation7 + $0x80] ss:$8 sps:$4 sm:$0xff]   ;;  %v1902_v54 = vld [vmem:[#allocation7 + $0x94] ss:$8 sps:$4 sm:$0xff]  }
  0x7f   :  { %974 = vmatpush1.bf16.msra.mxu0 %v1797_v9  ;;  %930 = vmatprep.subr.bf16.mxu1 %v1866_v29  ;;  %v2329_v53 = vld [vmem:[#allocation2 + $0x10] sm:$0xff]  ;;  %v1833_v56 = vld [vmem:[#allocation7 + $0x200] ss:$8 sps:$4 sm:$0xff]   ;;  %v1838_v57 = vld [vmem:[#allocation7 + $0x214] ss:$8 sps:$4 sm:$0xff]   ;;  %s2196_s18 = smov [#allocation13]  }
  0x80   :  { %975 = vmatprep.subr.bf16.mxu0 %v1798_v10  ;;  %v1546_v58 = vcombine.high %v2329_v53, %v2329_v53  ;;  %v1907_v59 = vld [vmem:[#allocation7 + $0x90] ss:$8 sps:$4 sm:$0xff]   ;;  %v1908_v60 = vld [vmem:[#allocation7 + $0xa4] ss:$8 sps:$4 sm:$0xff]   ;;  %v1913_v63 = vld [vmem:[#allocation7 + $0xa0] ss:$8 sps:$4 sm:$0xff]  }
  0x81   :  { %v1836_v61 = vld [vmem:[#allocation7 + $0x210] ss:$8 sps:$4 sm:$0xff]   ;;  %v1841_v62 = vld [vmem:[#allocation7 + $0x224] ss:$8 sps:$4 sm:$0xff]   ;;  %v1914_v0 = vld [vmem:[#allocation7 + $0xb4] ss:$8 sps:$4 sm:$0xff]  }
  0x82   :  { %931 = vmatpush1.bf16.msra.mxu1 %v1871_v32  ;;  %v1839_v1 = vld [vmem:[#allocation7 + $0x220] ss:$8 sps:$4 sm:$0xff]   ;;  %v1844_v3 = vld [vmem:[#allocation7 + $0x234] ss:$8 sps:$4 sm:$0xff]   ;;  %v1921_v4 = vld [vmem:[#allocation7 + $0xb0] ss:$8 sps:$4 sm:$0xff]  }
  0x83   :  { %976 = vmatpush1.bf16.msra.mxu0 %v1800_v11  ;;  %932 = vmatprep.subr.bf16.mxu1 %v1872_v33  ;;  %v112_v2 = vld [vmem:[#allocation2] sm:$0xff]  ;;  %v1922_v6 = vld [vmem:[#allocation7 + $0xc4] ss:$8 sps:$4 sm:$0xff]   ;;  %v1842_v7 = vld [vmem:[#allocation7 + $0x230] ss:$8 sps:$4 sm:$0xff]   ;;  %v2195_v32 = vmov 0  }
  0x84   :  { %977 = vmatprep.subr.bf16.mxu0 %v1801_v12  ;;  %v1542_v5 = vcombine.high %v112_v2, %v112_v2  ;;  %v1847_v8 = vld [vmem:[#allocation7 + $0x244] ss:$8 sps:$4 sm:$0xff]   ;;  %v1927_v9 = vld [vmem:[#allocation7 + $0xc0] ss:$8 sps:$4 sm:$0xff]   ;;  %v1928_v10 = vld [vmem:[#allocation7 + $0xd4] ss:$8 sps:$4 sm:$0xff]   ;;  %v1541_v25 = vcombine.low %v112_v2, %v112_v2 }
  0x85   :  { %v1845_v11 = vld [vmem:[#allocation7 + $0x240] ss:$8 sps:$4 sm:$0xff]   ;;  %v1852_v12 = vld [vmem:[#allocation7 + $0x254] ss:$8 sps:$4 sm:$0xff]   ;;  %v1933_v13 = vld [vmem:[#allocation7 + $0xd0] ss:$8 sps:$4 sm:$0xff]  }
  0x86   :  { %933 = vmatpush1.bf16.msra.mxu1 %v1877_v36  ;;  %956 = vmatprep.mubr.bf16.mxu1 %v1542_v5  ;;  %v1934_v14 = vld [vmem:[#allocation7 + $0xe4] ss:$8 sps:$4 sm:$0xff]   ;;  %v1856_v19 = vld [vmem:[#allocation7 + $0x260] ss:$8 sps:$4 sm:$0xff]   ;;  %v1945_v21 = vld [vmem:[#allocation7 + $0xf0] ss:$8 sps:$4 sm:$0xff]  }
  0x87   :  { %978 = vmatpush1.bf16.msra.mxu0 %v1803_v15  ;;  %934 = vmatprep.subr.bf16.mxu1 %v1878_v37  ;;  %v1850_v15 = vld [vmem:[#allocation7 + $0x250] ss:$8 sps:$4 sm:$0xff]   ;;  %v1953_v22 = vld [vmem:[#allocation8 + $0x4] ss:$8 sps:$4 sm:$0xff]   ;;  %v1868_v28 = vld [vmem:[#allocation7 + $0x280] ss:$8 sps:$4 sm:$0xff]  }
  0x88   :  { %979 = vmatprep.subr.bf16.mxu0 %v1804_v16  ;;  %v1858_v16 = vld [vmem:[#allocation7 + $0x264] ss:$8 sps:$4 sm:$0xff]   ;;  %v1876_v29 = vld [vmem:[#allocation7 + $0x294] ss:$8 sps:$4 sm:$0xff]   ;;  %v1936_v2 = vld [vmem:[#allocation7 + $0x330] ss:$8 sps:$4 sm:$0xff]  }
  0x89   :  { %v1870_v24 = vld [vmem:[#allocation7 + $0x284] ss:$8 sps:$4 sm:$0xff]   ;;  %v1948_v5 = vld [vmem:[#allocation7 + $0x350] ss:$8 sps:$4 sm:$0xff]   ;;  %s1529_s19 = sshll.u32 %s2196_s18, 4  ;;  %s1530_s19 = int_to_ptr.vmem [resolvable:$true] %s1529_s19 }
  0x8a   :  { %935 = vmatpush1.bf16.msra.mxu1 %v1883_v40  ;;  %v1989_v33 = vld [vmem:[#allocation11 + $0x40] sm:$0xff]   ;;  %v1991_v37 = vld [vmem:[#allocation11 + $0x48] sm:$0xff]   ;;  %s2153_s20 = scalar_lea.vmem %s1530_s19, 128  ;;  %p2158_p7 = scmp.lt.s32.totalorder %s1530_s19, %s1530_s19 }
  0x8b   :  { %980 = vmatpush1.bf16.msra.mxu0 %v1806_v17  ;;  %936 = vmatprep.subr.bf16.mxu1 %v1884_v41  ;;  %v1939_v17 = vld [vmem:[#allocation7 + $0xe0] ss:$8 sps:$4 sm:$0xff]   ;;  %v1993_v41 = vld [vmem:[#allocation11 + $0x50] sm:$0xff]   ;;  %p2154_p6 = scmp.ne.s32.totalorder %s1530_s19, %s2153_s20  ;;  %p2159_p8 = scmp.lt.s32.totalorder %s2153_s20, %s2153_s20 }
  0x8c   :  { %981 = vmatprep.subr.bf16.mxu0 %v1807_v18  ;;  %v1940_v18 = vld [vmem:[#allocation7 + $0xf4] ss:$8 sps:$4 sm:$0xff]   ;;  %v1990_v36 = vld [vmem:[#allocation11] sm:$0xff]   ;;  %v1992_v40 = vld [vmem:[#allocation11 + $0x8] sm:$0xff]  }
  0x8d   :  { %p2160_p9 = por %p2159_p8, %p2158_p7 }
  0x8e   :  { %937 = vmatpush1.bf16.msra.mxu1 %v1889_v44  ;;  %v1994_v44 = vld [vmem:[#allocation11 + $0x10] sm:$0xff]  }
  0x8f   :  { %982 = vmatpush1.bf16.msra.mxu0 %v1809_v20  ;;  %938 = vmatprep.subr.bf16.mxu1 %v1890_v45  ;;  %v1864_v20 = vld [vmem:[#allocation7 + $0x274] ss:$8 sps:$4 sm:$0xff]   ;;  %p2161_p10 = pnand %p2160_p9, %p2154_p6 }
  0x90   :  { %983 = vmatprep.subr.bf16.mxu0 %v1810_v23  ;;  %v1862_v23 = vld [vmem:[#allocation7 + $0x270] ss:$8 sps:$4 sm:$0xff]  }
  0x91   :  { %v1995_v45 = vld [vmem:[#allocation11 + $0x58] sm:$0xff]  }
  0x92   :  { %939 = vmatpush1.bf16.msra.mxu1 %v1895_v48  ;;  %v1996_v48 = vld [vmem:[#allocation11 + $0x18] sm:$0xff]  }
  0x93   :  { %984 = vmatpush1.bf16.msra.mxu0 %v1812_v26  ;;  %940 = vmatprep.subr.bf16.mxu1 %v1896_v49  ;;  %v1951_v26 = vld [vmem:[#allocation8] ss:$8 sps:$4 sm:$0xff]  }
  0x94   :  { %985 = vmatprep.subr.bf16.mxu0 %v1813_v27  ;;  %v1959_v27 = vld [vmem:[#allocation8 + $0x14] ss:$8 sps:$4 sm:$0xff]   ;;  %v1997_v49 = vld [vmem:[#allocation11 + $0x60] sm:$0xff]  }
  0x96   :  { %941 = vmatpush1.bf16.msra.mxu1 %v1901_v52  ;;  %v1904_v52 = vld [vmem:[#allocation7 + $0x2e0] ss:$8 sps:$4 sm:$0xff]  }
  0x97   :  { %986 = vmatpush1.bf16.msra.mxu0 %v1815_v30  ;;  %942 = vmatprep.subr.bf16.mxu1 %v1902_v54  ;;  %v1957_v30 = vld [vmem:[#allocation8 + $0x10] ss:$8 sps:$4 sm:$0xff]   ;;  %v1912_v54 = vld [vmem:[#allocation7 + $0x2f4] ss:$8 sps:$4 sm:$0xff]  }
  0x98   :  { %987 = vmatprep.subr.bf16.mxu0 %v1816_v31  ;;  %v1874_v31 = vld [vmem:[#allocation7 + $0x290] ss:$8 sps:$4 sm:$0xff]  }
  0x9a   :  { %943 = vmatpush1.bf16.msra.mxu1 %v1907_v59  ;;  %v1918_v59 = vld [vmem:[#allocation7 + $0x300] ss:$8 sps:$4 sm:$0xff]  }
  0x9b   :  { %988 = vmatpush1.bf16.msra.mxu0 %v1818_v34  ;;  %944 = vmatprep.subr.bf16.mxu1 %v1908_v60  ;;  %v1882_v34 = vld [vmem:[#allocation7 + $0x2a4] ss:$8 sps:$4 sm:$0xff]  }
  0x9c   :  { %989 = vmatprep.subr.bf16.mxu0 %v1819_v35  ;;  %v1090_v35 = vld [vmem:[#allocation5] sm:$0xf] }
  0x9e   :  { %945 = vmatpush1.bf16.msra.mxu1 %v1913_v63  ;;  %v1932_v63 = vld [vmem:[#allocation7 + $0x324] ss:$8 sps:$4 sm:$0xff]  }
  0x9f   :  { %990 = vmatpush1.bf16.msra.mxu0 %v1821_v38  ;;  %946 = vmatprep.subr.bf16.mxu1 %v1914_v0  ;;  %v1880_v38 = vld [vmem:[#allocation7 + $0x2a0] ss:$8 sps:$4 sm:$0xff]  }
  0xa0   :  { %991 = vmatprep.subr.bf16.mxu0 %v1822_v39  ;;  %v1888_v39 = vld [vmem:[#allocation7 + $0x2b4] ss:$8 sps:$4 sm:$0xff]   ;;  %v1930_v0 = vld [vmem:[#allocation7 + $0x320] ss:$8 sps:$4 sm:$0xff]  }
  0xa2   :  { %947 = vmatpush1.bf16.msra.mxu1 %v1921_v4  ;;  %v1950_v4 = vld [vmem:[#allocation7 + $0x354] ss:$8 sps:$4 sm:$0xff]  }
  0xa3   :  { %992 = vmatpush1.bf16.msra.mxu0 %v1824_v42  ;;  %948 = vmatprep.subr.bf16.mxu1 %v1922_v6  ;;  %v1886_v42 = vld [vmem:[#allocation7 + $0x2b0] ss:$8 sps:$4 sm:$0xff]   ;;  %v1956_v6 = vld [vmem:[#allocation7 + $0x364] ss:$8 sps:$4 sm:$0xff]  }
  0xa4   :  { %993 = vmatprep.subr.bf16.mxu0 %v1825_v43  ;;  %v1894_v43 = vld [vmem:[#allocation7 + $0x2c4] ss:$8 sps:$4 sm:$0xff]  }
  0xa6   :  { %949 = vmatpush1.bf16.msra.mxu1 %v1927_v9  ;;  %v1960_v9 = vld [vmem:[#allocation7 + $0x370] ss:$8 sps:$4 sm:$0xff]  }
  0xa7   :  { %994 = vmatpush1.bf16.msra.mxu0 %v1827_v46  ;;  %950 = vmatprep.subr.bf16.mxu1 %v1928_v10  ;;  %v1892_v46 = vld [vmem:[#allocation7 + $0x2c0] ss:$8 sps:$4 sm:$0xff]   ;;  %v1965_v10 = vld [vmem:[#allocation7 + $0x384] ss:$8 sps:$4 sm:$0xff]  }
  0xa8   :  { %995 = vmatprep.subr.bf16.mxu0 %v1828_v47  ;;  %v1900_v47 = vld [vmem:[#allocation7 + $0x2d4] ss:$8 sps:$4 sm:$0xff]  }
  0xaa   :  { %951 = vmatpush1.bf16.msra.mxu1 %v1933_v13  ;;  %v1966_v13 = vld [vmem:[#allocation7 + $0x390] ss:$8 sps:$4 sm:$0xff]  }
  0xab   :  { %996 = vmatpush1.bf16.msra.mxu0 %v1830_v50  ;;  %952 = vmatprep.subr.bf16.mxu1 %v1934_v14  ;;  %v1898_v50 = vld [vmem:[#allocation7 + $0x2d0] ss:$8 sps:$4 sm:$0xff]   ;;  %v1971_v14 = vld [vmem:[#allocation7 + $0x3a4] ss:$8 sps:$4 sm:$0xff]  }
  0xac   :  { %1006 = vmatprep.subr.bf16.mxu0 %v1835_v51  ;;  %v1906_v51 = vld [vmem:[#allocation7 + $0x2e4] ss:$8 sps:$4 sm:$0xff]  }
  0xae   :  { %998 = vmatmul.mubr.bf16.vlgmr.msra.gmra.mrb[0].mxu0 %v1543_v55  ;;  %953 = vmatpush1.bf16.msra.mxu1 %v1939_v17  ;;  %v1910_v55 = vld [vmem:[#allocation7 + $0x2f0] ss:$8 sps:$4 sm:$0xff]  }
  0xaf   :  { %1007 = vmatpush1.bf16.msra.mxu0 %v1833_v56  ;;  %1038 = vmatprep.mubr.bf16.mxu0 %v1546_v58  ;;  %v1920_v56 = vld [vmem:[#allocation7 + $0x304] ss:$8 sps:$4 sm:$0xff]   ;;  %v1545_v58 = vcombine.low %v2329_v53, %v2329_v53  ;;  %v1972_v17 = vld [vmem:[#allocation7 + $0x3b0] ss:$8 sps:$4 sm:$0xff]  }
  0xb0   :  { %1008 = vmatprep.subr.bf16.mxu0 %v1838_v57  ;;  %954 = vmatprep.subr.bf16.mxu1 %v1940_v18  ;;  %v2335_v57 = vld [vmem:[#allocation2 + $0x18] sm:$0xff]  ;;  %v1944_v53 = vld [vmem:[#allocation7 + $0x344] ss:$8 sps:$4 sm:$0xff]  }
  0xb1   :  { %v1548_v60 = vcombine.high %v2335_v57, %v2335_v57  ;;  %v1977_v18 = vld [vmem:[#allocation7 + $0x3c4] ss:$8 sps:$4 sm:$0xff]  }
  0xb2   :  { %955 = vmatpush1.bf16.msra.mxu1 %v1945_v21  ;;  %v1978_v21 = vld [vmem:[#allocation7 + $0x3d0] ss:$8 sps:$4 sm:$0xff]  }
  0xb3   :  { %1009 = vmatpush1.bf16.msra.mxu0 %v1836_v61  ;;  %1131 = vmatprep.subr.bf16.mxu1 %v1953_v22  ;;  %v1926_v61 = vld [vmem:[#allocation7 + $0x314] ss:$8 sps:$4 sm:$0xff]   ;;  %v1998_v22 = vld [vmem:[#allocation11 + $0x20] sm:$0xff]  }
  0xb4   :  { %1010 = vmatprep.subr.bf16.mxu0 %v1841_v62  ;;  %v1924_v62 = vld [vmem:[#allocation7 + $0x310] ss:$8 sps:$4 sm:$0xff]  }
  0xb5   :  { %957 = vmatmul.mubr.bf16.vlgmr.msra.gmra.mrb[0].mxu1 %v1541_v25  ;;  %v2000_v25 = vld [vmem:[#allocation11 + $0x28] sm:$0xff]  }
  0xb6   :  { %1132 = vmatpush1.bf16.msra.mxu1 %v1951_v26  ;;  %1163 = vmatprep.mubr.bf16.mxu1 %v2195_v32  ;;  %v1981_v26 = vld [vmem:[#allocation7 + $0x3e0] ss:$8 sps:$4 sm:$0xff]   ;;  %v2003_v32 = vld [vmem:[#allocation11 + $0x78] sm:$0xff]  }
  0xb7   :  { %1011 = vmatpush1.bf16.msra.mxu0 %v1839_v1  ;;  %1133 = vmatprep.subr.bf16.mxu1 %v1959_v27  ;;  %v1938_v1 = vld [vmem:[#allocation7 + $0x334] ss:$8 sps:$4 sm:$0xff]  }
  0xb8   :  { %1012 = vmatprep.subr.bf16.mxu0 %v1844_v3  ;;  %v1942_v3 = vld [vmem:[#allocation7 + $0x340] ss:$8 sps:$4 sm:$0xff]   ;;  %v1986_v27 = vld [vmem:[#allocation7 + $0x3f4] ss:$8 sps:$4 sm:$0xff]  }
  0xba   :  { %1134 = vmatpush1.bf16.msra.mxu1 %v1957_v30  ;;  %v2001_v30 = vld [vmem:[#allocation11 + $0x70] sm:$0xff]  }
  0xbb   :  { %1013 = vmatpush1.bf16.msra.mxu0 %v1842_v7  ;;  %1715 = vmatprep.subr.bf16.mxu1 %v1989_v33  ;;  %v1954_v7 = vld [vmem:[#allocation7 + $0x360] ss:$8 sps:$4 sm:$0xff]   ;;  %v2004_v33 = vld [vmem:[#allocation11 + $0x38] sm:$0xff]  }
  0xbc   :  { %1014 = vmatprep.subr.bf16.mxu0 %v1847_v8  ;;  %v1962_v8 = vld [vmem:[#allocation7 + $0x374] ss:$8 sps:$4 sm:$0xff]  }
  0xbd   :  { %1681 = vmatmul.mubr.msk.bf16.vlgmr.msra.gmra.mrb[4].mxu1 %vm1127_vm0, %v1090_v35  ;;  %v246_v35 = vlaneseq }
  0xbe   :  { %1716 = vmatpush3.bf16.msra.mxu1 %v1990_v36 }
  0xbf   :  { %1015 = vmatpush1.bf16.msra.mxu0 %v1845_v11  ;;  %1717 = vmatprep.subr.bf16.mxu1 %v1991_v37  ;;  %v1963_v11 = vld [vmem:[#allocation7 + $0x380] ss:$8 sps:$4 sm:$0xff]   ;;  %v247_v36 = vshrl.u32 %v246_v35, 7 }
  0xc0   :  { %1016 = vmatprep.subr.bf16.mxu0 %v1852_v12  ;;  %v1968_v12 = vld [vmem:[#allocation7 + $0x394] ss:$8 sps:$4 sm:$0xff]  }
  0xc1   :  { %v252_v37 = vsub.s32 1, %v247_v36 }
  0xc2   :  { %1718 = vmatpush3.bf16.msra.mxu1 %v1992_v40 }
  0xc3   :  { %1017 = vmatpush1.bf16.msra.mxu0 %v1850_v15  ;;  %1719 = vmatprep.subr.bf16.mxu1 %v1993_v41  ;;  %v1969_v15 = vld [vmem:[#allocation7 + $0x3a0] ss:$8 sps:$4 sm:$0xff]  }
  0xc4   :  { %1018 = vmatprep.subr.bf16.mxu0 %v1858_v16  ;;  %v1974_v16 = vld [vmem:[#allocation7 + $0x3b4] ss:$8 sps:$4 sm:$0xff]  }
  0xc6   :  { %1720 = vmatpush3.bf16.msra.mxu1 %v1994_v44  ;;  %v1095_v44 = vld [vmem:[%s2369_s5] sm:$0x3] }
  0xc7   :  { %1019 = vmatpush1.bf16.msra.mxu0 %v1856_v19  ;;  %1721 = vmatprep.subr.bf16.mxu1 %v1995_v45  ;;  %v1975_v19 = vld [vmem:[#allocation7 + $0x3c0] ss:$8 sps:$4 sm:$0xff]   ;;  %v248_v45 = vsub.s32 0, %v247_v36 }
  0xc8   :  { %1020 = vmatprep.subr.bf16.mxu0 %v1864_v20  ;;  %v1980_v20 = vld [vmem:[#allocation7 + $0x3d4] ss:$8 sps:$4 sm:$0xff]  }
  0xca   :  { %1722 = vmatpush3.bf16.msra.mxu1 %v1996_v48  ;;  %v1104_v48 = vrot.slane %v1095_v44, %v252_v37 }
  0xcb   :  { %1021 = vmatpush1.bf16.msra.mxu0 %v1862_v23  ;;  %1723 = vmatprep.subr.bf16.mxu1 %v1997_v49  ;;  %v1983_v23 = vld [vmem:[#allocation7 + $0x3e4] ss:$8 sps:$4 sm:$0xff]  }
  0xcc   :  { %1022 = vmatprep.subr.bf16.mxu0 %v1870_v24  ;;  %v1999_v24 = vld [vmem:[#allocation11 + $0x68] sm:$0xff]  }
  0xce   :  { %1724 = vmatpush3.bf16.msra.mxu1 %v1998_v22 }
  0xcf   :  { %1023 = vmatpush1.bf16.msra.mxu0 %v1868_v28  ;;  %1725 = vmatprep.subr.bf16.mxu1 %v1999_v24  ;;  %v1984_v28 = vld [vmem:[#allocation7 + $0x3f0] ss:$8 sps:$4 sm:$0xff]  }
  0xd0   :  { %1024 = vmatprep.subr.bf16.mxu0 %v1876_v29  ;;  %v1547_v29 = vcombine.low %v2335_v57, %v2335_v57 }
  0xd2   :  { %1726 = vmatpush3.bf16.msra.mxu1 %v2000_v25 }
  0xd3   :  { %1025 = vmatpush1.bf16.msra.mxu0 %v1874_v31  ;;  %v2002_v31 = vld [vmem:[#allocation11 + $0x30] sm:$0xff]   ;;  %1727 = vmatprep.subr.bf16.mxu1 %v2001_v30 }
  0xd4   :  { %1026 = vmatprep.subr.bf16.mxu0 %v1882_v34  ;;  %v2005_v34 = vld [vmem:[#allocation10 + $0x40] sm:$0xff]  }
  0xd6   :  { %1728 = vmatpush3.bf16.msra.mxu1 %v2002_v31 }
  0xd7   :  { %1027 = vmatpush1.bf16.msra.mxu0 %v1880_v38  ;;  %1729 = vmatprep.subr.bf16.mxu1 %v2003_v32  ;;  %v244_v38 = vld [vmem:[%s2367_s3] sm:$0x3] }
  0xd8   :  { %1028 = vmatprep.subr.bf16.mxu0 %v1888_v39  ;;  %v253_v39 = vrot.slane %v244_v38, %v252_v37  ;;  %v1714_v32 = vld [vmem:[%s2372_s8] ss:$0 sm:$0xff] }
  0xda   :  { %1730 = vmatpush3.bf16.msra.mxu1 %v2004_v33 }
  0xdb   :  { %1029 = vmatpush1.bf16.msra.mxu0 %v1886_v42  ;;  %1737 = vmatprep.subr.bf16.mxu1 %v2005_v34 }
  0xdc   :  { %1030 = vmatprep.subr.bf16.mxu0 %v1894_v43 }
  0xdf   :  { %1031 = vmatpush1.bf16.msra.mxu0 %v1892_v46 }
  0xe0   :  { %1032 = vmatprep.subr.bf16.mxu0 %v1900_v47  ;;  %v1100_v47 = vrot.slane %v1095_v44, %v248_v45 }
  0xe3   :  { %1033 = vmatpush1.bf16.msra.mxu0 %v1898_v50 }
  0xe4   :  { %1034 = vmatprep.subr.bf16.mxu0 %v1906_v51 }
  0xe7   :  { %1035 = vmatpush1.bf16.msra.mxu0 %v1904_v52 }
  0xe8   :  { %1036 = vmatprep.subr.bf16.mxu0 %v1912_v54 }
  0xeb   :  { %1037 = vmatpush1.bf16.msra.mxu0 %v1910_v55 }
  0xec   :  { %1047 = vmatprep.subr.bf16.mxu0 %v1920_v56 }
  0xee   :  { %1039 = vmatmul.mubr.bf16.vlgmr.msra.gmra.mrb[0].mxu0 %v1545_v58 }
  0xef   :  { %1048 = vmatpush1.bf16.msra.mxu0 %v1918_v59  ;;  %1079 = vmatprep.mubr.bf16.mxu0 %v1548_v60  ;;  %v2006_v60 = vld [vmem:[#allocation10] sm:$0xff]  }
  0xf0   :  { %1049 = vmatprep.subr.bf16.mxu0 %v1926_v61  ;;  %v2007_v61 = vld [vmem:[#allocation10 + $0x48] sm:$0xff]  }
  0xf3   :  { %1050 = vmatpush1.bf16.msra.mxu0 %v1924_v62  ;;  %v2008_v62 = vld [vmem:[#allocation10 + $0x8] sm:$0xff]  }
  0xf4   :  { %1051 = vmatprep.subr.bf16.mxu0 %v1932_v63  ;;  %v2009_v63 = vld [vmem:[#allocation10 + $0x50] sm:$0xff]  }
  0xf7   :  { %1052 = vmatpush1.bf16.msra.mxu0 %v1930_v0  ;;  %v2010_v0 = vld [vmem:[#allocation10 + $0x10] sm:$0xff]  }
  0xf8   :  { %1053 = vmatprep.subr.bf16.mxu0 %v1938_v1  ;;  %v2011_v1 = vld [vmem:[#allocation10 + $0x58] sm:$0xff]  }
  0xfb   :  { %1054 = vmatpush1.bf16.msra.mxu0 %v1936_v2  ;;  %v2012_v2 = vld [vmem:[#allocation10 + $0x18] sm:$0xff]  }
  0xfc   :  { %1055 = vmatprep.subr.bf16.mxu0 %v1944_v53  ;;  %v2013_v53 = vld [vmem:[#allocation10 + $0x60] sm:$0xff]  }
  0xff   :  { %1056 = vmatpush1.bf16.msra.mxu0 %v1942_v3  ;;  %v2014_v3 = vld [vmem:[#allocation10 + $0x20] sm:$0xff]  }
 0x100   :  { %1057 = vmatprep.subr.bf16.mxu0 %v1950_v4  ;;  %v2015_v4 = vld [vmem:[#allocation10 + $0x68] sm:$0xff]  }
 0x103   :  { %1058 = vmatpush1.bf16.msra.mxu0 %v1948_v5  ;;  %v2016_v5 = vld [vmem:[#allocation10 + $0x28] sm:$0xff]  }
 0x104   :  { %1059 = vmatprep.subr.bf16.mxu0 %v1956_v6  ;;  %v2017_v6 = vld [vmem:[#allocation10 + $0x70] sm:$0xff]  }
 0x107   :  { %1060 = vmatpush1.bf16.msra.mxu0 %v1954_v7  ;;  %v2018_v7 = vld [vmem:[#allocation10 + $0x30] sm:$0xff]  }
 0x108   :  { %1061 = vmatprep.subr.bf16.mxu0 %v1962_v8  ;;  %v2019_v8 = vld [vmem:[#allocation10 + $0x78] sm:$0xff]  }
 0x10b   :  { %1062 = vmatpush1.bf16.msra.mxu0 %v1960_v9  ;;  %v2020_v9 = vld [vmem:[#allocation10 + $0x38] sm:$0xff]  }
 0x10c   :  { %1063 = vmatprep.subr.bf16.mxu0 %v1965_v10  ;;  %v249_v10 = vrot.slane %v244_v38, %v248_v45 }
 0x10f   :  { %1064 = vmatpush1.bf16.msra.mxu0 %v1963_v11 }
 0x110   :  { %1065 = vmatprep.subr.bf16.mxu0 %v1968_v12 }
 0x113   :  { %1066 = vmatpush1.bf16.msra.mxu0 %v1966_v13 }
 0x114   :  { %1067 = vmatprep.subr.bf16.mxu0 %v1971_v14 }
 0x117   :  { %1068 = vmatpush1.bf16.msra.mxu0 %v1969_v15 }
 0x118   :  { %1069 = vmatprep.subr.bf16.mxu0 %v1974_v16 }
 0x11b   :  { %1070 = vmatpush1.bf16.msra.mxu0 %v1972_v17 }
 0x11c   :  { %1071 = vmatprep.subr.bf16.mxu0 %v1977_v18 }
 0x11f   :  { %1072 = vmatpush1.bf16.msra.mxu0 %v1975_v19 }
 0x120   :  { %1073 = vmatprep.subr.bf16.mxu0 %v1980_v20 }
 0x123   :  { %1074 = vmatpush1.bf16.msra.mxu0 %v1978_v21 }
 0x124   :  { %1075 = vmatprep.subr.bf16.mxu0 %v1983_v23 }
 0x127   :  { %1076 = vmatpush1.bf16.msra.mxu0 %v1981_v26 }
 0x128   :  { %1077 = vmatprep.subr.bf16.mxu0 %v1986_v27 }
 0x12b   :  { %1078 = vmatpush1.bf16.msra.mxu0 %v1984_v28 }
 0x12e   :  { %1080 = vmatmul.mubr.bf16.vlgmr.msra.gmra.mrb[0].mxu0 %v1547_v29 }
 0x188   :  { %v958_v40 = vpop.f32.mrb[0].mxu1 }
 0x189   :  { %v960_v41 = vpop.f32.mrb[1].mxu1  ;;  %v959_v11 = vadd.f32 %v958_v40, %v249_v10 }
 0x18a   :  { %v961_v42 = vadd.f32 %v960_v41, %v253_v39  ;;  %v962_v43 = vpop.f32.mrb[2].mxu1 }
 0x18b   :  { %v963_v46 = vpop.f32.mrb[3].mxu1 }
 0x190   :  { %v1165_v49 = vpop.f32.mrb[4].mxu1 }
 0x191   :  { %v1166_v50 = vadd.f32 %v1165_v49, %v1100_v47  ;;  %v1167_v51 = vpop.f32.mrb[5].mxu1 }
 0x192   :  { %v1168_v52 = vadd.f32 %v1167_v51, %v1104_v48  ;;  %v1169_v54 = vpop.f32.mrb[6].mxu1 }
 0x193   :  { %v1172_v55 = vmax.f32 %v1166_v50, 0.0  ;;  %v1170_v56 = vpop.f32.mrb[7].mxu1 }
 0x194   :  { %v1173_v57 = vmax.f32 %v1168_v52, 0.0 }
 0x195   :  { %v1208_v58 = vpack.c.bf16 %v1172_v55, %v1172_v55 }
 0x196   :  { %v1209_v59 = vpack.c.bf16 %v1173_v57, %v1173_v57 }
 0x198   :  { %1370 = vmatprep.mubr.bf16.mxu1 %v1209_v59 }
 0x199   :  { %1371 = vmatmul.mubr.bf16.vlgmr.msra.gmra.mrb[8].mxu1 %v1208_v58 }
 0x19a   :  { %1738 = vmatpush3.bf16.msra.mxu1 %v2006_v60 }
 0x19b   :  { %1739 = vmatprep.subr.bf16.mxu1 %v2007_v61 }
 0x19e   :  { %1740 = vmatpush3.bf16.msra.mxu1 %v2008_v62 }
 0x19f   :  { %1741 = vmatprep.subr.bf16.mxu1 %v2009_v63 }
 0x1a2   :  { %1742 = vmatpush3.bf16.msra.mxu1 %v2010_v0 }
 0x1a3   :  { %1743 = vmatprep.subr.bf16.mxu1 %v2011_v1 }
 0x1a6   :  { %1744 = vmatpush3.bf16.msra.mxu1 %v2012_v2 }
 0x1a7   :  { %1745 = vmatprep.subr.bf16.mxu1 %v2013_v53 }
 0x1aa   :  { %1746 = vmatpush3.bf16.msra.mxu1 %v2014_v3 }
 0x1ab   :  { %1747 = vmatprep.subr.bf16.mxu1 %v2015_v4 }
 0x1ae   :  { %1748 = vmatpush3.bf16.msra.mxu1 %v2016_v5 }
 0x1af   :  { %1749 = vmatprep.subr.bf16.mxu1 %v2017_v6 }
 0x1b2   :  { %1750 = vmatpush3.bf16.msra.mxu1 %v2018_v7 }
 0x1b3   :  { %1751 = vmatprep.subr.bf16.mxu1 %v2019_v8 }
 0x1b6   :  { %1752 = vmatpush3.bf16.msra.mxu1 %v2020_v9 }
 0x201   :  { %v1081_v12 = vpop.f32.mrb[0].mxu0 }
 0x202   :  { %v1760_v13 = vadd.f32 %v1081_v12, %v959_v11  ;;  %v1083_v14 = vpop.f32.mrb[1].mxu0 }
 0x203   :  { %v1762_v15 = vadd.f32 %v1083_v14, %v961_v42  ;;  %v1085_v16 = vpop.f32.mrb[2].mxu0 }
 0x204   :  { %v1088_v17 = vmax.f32 %v1760_v13, 0.0  ;;  %v1086_v18 = vpop.f32.mrb[3].mxu0 }
 0x205   :  { %v1089_v19 = vmax.f32 %v1762_v15, 0.0 }
 0x206   :  { %v1174_v21 = vpack.c.bf16 %v1088_v17, %v1088_v17 }
 0x207   :  { %v1175_v20 = vpack.c.bf16 %v1089_v19, %v1089_v19 }
 0x209   :  { %1506 = vmatprep.mubr.bf16.mxu1 %v1175_v20 }
 0x20a   :  { %1507 = vmatmul.mubr.bf16.vlgmr.msra.gmra.mrb[12].mxu1 %v1174_v21 }
 0x26c   :  { %v1731_v22 = vpop.f32.mrb[8].mxu1 }
 0x26d   :  { %v1732_v23 = vpop.f32.mrb[9].mxu1 }
 0x26e   :  { %v1733_v24 = vadd.f32 %v1732_v23, %v1731_v22  ;;  %v1734_v25 = vpop.f32.mrb[10].mxu1 }
 0x26f   :  { %v1735_v26 = vpop.f32.mrb[11].mxu1 }
 0x2dd   :  { %v1753_v27 = vpop.f32.mrb[12].mxu1 }
 0x2de   :  { %v1754_v28 = vpop.f32.mrb[13].mxu1 }
 0x2df   :  { %v1755_v29 = vadd.f32 %v1754_v28, %v1753_v27  ;;  %v1756_v30 = vpop.f32.mrb[14].mxu1 }
 0x2e0   :  { %v1757_v31 = vpop.f32.mrb[15].mxu1 }
 0x2e1   :  { %v1509_v33 = vadd.f32 %v1755_v29, %v1733_v24 }
 0x2e3   :  { %v1521_v34 = vadd.f32 %v1714_v32, %v1509_v33 }
 0x2e5   :  { %1522 = vst [vmem:[#allocation13] sm:$0xff] %v1521_v34 }
 0x2e6   :  { %2164 = shalt.err (!%p2161_p10)
}
 0x2e7   :  { %s2165_s4 = scalar_lea.hbm %s2373_s9, 128 }
 0x2e8   :  { %p2166_p11 = scmp.ne.s32.totalorder %s2373_s9, %s2165_s4  ;;  %p2169_p12 = scmp.lt.u32.totalorder %s2165_s4, %s2373_s9 }
 0x2ea   :  { %p2171_p13 = pnand %p2169_p12, %p2166_p11 }
 0x2ec   :  { %2174 = shalt.err (!%p2171_p13)
}
 0x2ed   :  { %1532 = dma.vmem_to_hbm [thread:$0]  %s1530_s19, 128, %s2373_s9, [#allocation4]  }
 0x2ee   :  { %2183 = dma.done.wait [#allocation4], 128  }
 0x2ef   :  { %2184 = vsyncadd [#allocation4], 4294967168 }
 0x2f0   :  { %1536 = vsyncpa [#allocation3], 1 }
 0x2f1   :  { %1537 = vsyncpa [#allocation6], 1 }
 0x2f2   :  { %1538 = vsyncpa [#allocation9], 1 }
 0x2f3   :  { %1539 = vsyncpa [#allocation12], 1 }
 0x2f4   :  { %1540 = vsyncpa [#allocation4], 1 }

</bundles_post_ra>
